<compile_context>
chip_gen: v5e
topology: v5e:2x2
jax: 0.10.0
libtpu: 0.0.40
codegen_flags: <defaults>
</compile_context>

<pallas_src>
import math

import jax
import jax.numpy as jnp
from jax.experimental import pallas as pl
from jax.experimental.pallas import tpu as pltpu


# ---------------------------------------------------------------------------
# Fused Pallas kernel: conv1 -> conv2 -> conv3 -> fc1..fc4 -> softmax (128-wide)
# ---------------------------------------------------------------------------
def _policy_fused_kernel(x_ref, w1_ref, w2_ref, w3_ref, fcw_ref, fw4_ref, b_ref, o_ref):
    f32, bf16 = jnp.float32, jnp.bfloat16

    x = x_ref[...].astype(bf16)          # (bb, 16) flattened 4x4 board, columns (h, w)
    b = b_ref[...]                       # (8, 144) packed f32 biases
    b1 = b[0:1, :144]                    # conv1 bias tiled over 9 positions
    b2 = b[1:2, :128]                    # conv2 bias tiled over 4 positions
    b3 = b[2:3, :64]
    fb1 = b[3:4, :64]
    fb2 = b[4:5, :64]
    fb3 = b[5:6, :64]
    fb4 = b[6:7, :128]                   # fc4 bias, padded lanes carry -1e9

    # conv1 (1->16, 2x2, 9 output positions) as ONE block-structured MXU GEMM.
    h = jnp.maximum(jnp.dot(x, w1_ref[...], preferred_element_type=f32) + b1, 0.0)          # (bb,144)
    # conv2 (16->32, 2x2, 4 positions) as ONE block-sparse MXU GEMM; output column order
    # is (h, w, c), i.e. exactly the conv3 im2col layout -> no concatenates needed.
    h = jnp.maximum(jnp.dot(h.astype(bf16), w2_ref[...], preferred_element_type=f32) + b2, 0.0)  # (bb,128)
    # conv3 (32->64, 2x2) -> 1x1 spatial.
    h = jnp.maximum(jnp.dot(h.astype(bf16), w3_ref[...], preferred_element_type=f32) + b3, 0.0)  # (bb,64)
    # fc1 -> fc2 -> fc3 (ReLU); weights are stacked rows [0:64], [64:128], [128:192].
    h = jnp.maximum(jnp.dot(h.astype(bf16), fcw_ref[0:64, :], preferred_element_type=f32) + fb1, 0.0)
    h = jnp.maximum(jnp.dot(h.astype(bf16), fcw_ref[64:128, :], preferred_element_type=f32) + fb2, 0.0)
    h = jnp.maximum(jnp.dot(h.astype(bf16), fcw_ref[128:192, :], preferred_element_type=f32) + fb3, 0.0)
    # fc4 into a lane-dense 128-wide logit slab; padded logits are -1e9 -> exp == 0.
    z = jnp.dot(h.astype(bf16), fw4_ref[...], preferred_element_type=f32) + fb4              # (bb,128)
    z = z - jnp.max(z, axis=-1, keepdims=True)
    e = jnp.exp(z)
    # divide -> EUP approximate reciprocal + VPU multiply (free slot, shorter chain)
    o_ref[...] = e * pl.reciprocal(jnp.sum(e, axis=-1, keepdims=True), approx=True)


# ---------------------------------------------------------------------------
# Parameters (deterministic, PyTorch-default-style uniform init; PyTorch layout)
# ---------------------------------------------------------------------------
def init_params(key, output_size=4):
    def uniform(k, shape, fan_in):
        bound = 1.0 / math.sqrt(fan_in)
        return jax.random.uniform(k, shape, jnp.float32, -bound, bound)

    ks = jax.random.split(key, 14)
    p = {}
    p["conv1_w"] = uniform(ks[0], (16, 1, 2, 2), 1 * 2 * 2)
    p["conv1_b"] = uniform(ks[1], (16,), 1 * 2 * 2)
    p["conv2_w"] = uniform(ks[2], (32, 16, 2, 2), 16 * 2 * 2)
    p["conv2_b"] = uniform(ks[3], (32,), 16 * 2 * 2)
    p["conv3_w"] = uniform(ks[4], (64, 32, 2, 2), 32 * 2 * 2)
    p["conv3_b"] = uniform(ks[5], (64,), 32 * 2 * 2)
    p["fc1_w"] = uniform(ks[6], (64, 64), 64)
    p["fc1_b"] = uniform(ks[7], (64,), 64)
    p["fc2_w"] = uniform(ks[8], (64, 64), 64)
    p["fc2_b"] = uniform(ks[9], (64,), 64)
    p["fc3_w"] = uniform(ks[10], (64, 64), 64)
    p["fc3_b"] = uniform(ks[11], (64,), 64)
    p["fc4_w"] = uniform(ks[12], (output_size, 64), 64)
    p["fc4_b"] = uniform(ks[13], (64,), 64) if output_size == 64 else uniform(ks[13], (output_size,), 64)
    return p


def prepare_params(params):
    """One-time layout transform to kernel-native shapes (call OUTSIDE jit, once)."""
    f32, bf16 = jnp.float32, jnp.bfloat16
    out_size = params["fc4_w"].shape[0]
    assert out_size <= 128

    # Conv weights in (kh, kw, cin, O) tap order.
    w1 = jnp.transpose(params["conv1_w"], (2, 3, 1, 0)).reshape(4, 16)     # tap -> 16 ch
    w2 = jnp.transpose(params["conv2_w"], (2, 3, 1, 0)).reshape(64, 32)    # (di,dj,cin) -> 32 ch
    w3 = jnp.transpose(params["conv3_w"], (2, 3, 1, 0)).reshape(128, 64)   # (h,w,cin)  -> 64 ch

    # conv1 as one block-structured GEMM: board lane (h*4+w) -> column block per position (i,j).
    W1 = jnp.zeros((16, 9 * 16), f32)
    for i in range(3):
        for j in range(3):
            col0 = (i * 3 + j) * 16
            for di in range(2):
                for dj in range(2):
                    row = (i + di) * 4 + (j + dj)
                    W1 = W1.at[row, col0:col0 + 16].set(w1[di * 2 + dj])

    # conv2 as one block-sparse GEMM: h1 column block ((i+di)*3+(j+dj)) -> h2 column block (i*2+j),
    # h2 columns in (h, w, c) order so it is already the conv3 im2col.
    W2 = jnp.zeros((144, 128), f32)
    for i in range(2):
        for j in range(2):
            ocol0 = (i * 2 + j) * 32
            for di in range(2):
                for dj in range(2):
                    irow0 = ((i + di) * 3 + (j + dj)) * 16
                    tap0 = (di * 2 + dj) * 16
                    W2 = W2.at[irow0:irow0 + 16, ocol0:ocol0 + 32].set(w2[tap0:tap0 + 16])

    # fc1..fc3 weights stacked on the sublane axis; fc4 padded lane-dense to 128 columns.
    fcw = jnp.concatenate(
        [params["fc1_w"].T, params["fc2_w"].T, params["fc3_w"].T], axis=0)        # (192, 64)
    fw4 = jnp.zeros((64, 128), f32).at[:, :out_size].set(params["fc4_w"].T)

    # All biases packed into one (8, 144) f32 slab (row = layer). Padded fc4 lanes = -1e9.
    bias = jnp.zeros((8, 144), f32)
    bias = bias.at[0, :144].set(jnp.tile(params["conv1_b"], 9))
    bias = bias.at[1, :128].set(jnp.tile(params["conv2_b"], 4))
    bias = bias.at[2, :64].set(params["conv3_b"])
    bias = bias.at[3, :64].set(params["fc1_b"])
    bias = bias.at[4, :64].set(params["fc2_b"])
    bias = bias.at[5, :64].set(params["fc3_b"])
    fb4 = jnp.full((128,), -1e9, f32).at[:out_size].set(params["fc4_b"])
    bias = bias.at[6, :128].set(fb4)

    return {
        "w1": W1.astype(bf16), "w2": W2.astype(bf16), "w3": w3.astype(bf16),
        "fcw": fcw.astype(bf16), "fw4": fw4.astype(bf16), "bias": bias,
    }


# ---------------------------------------------------------------------------
# Forward pass (matches PolicyNetwork.forward) — one pallas_call, batched grid
# ---------------------------------------------------------------------------
def policy_forward(kparams, x_nchw, *, out_size=4, block_b=1024):
    assert block_b % 8 == 0
    B = x_nchw.shape[0]
    # NCHW (B,1,4,4) -> (B,16): pure reshape since C == 1; columns are (h, w).
    x = x_nchw.reshape(B, 16).astype(jnp.float32)

    bb = B if B <= block_b else block_b
    Bp = pl.cdiv(B, bb) * bb
    if Bp != B:
        x = jnp.pad(x, ((0, Bp - B), (0, 0)))
    grid = (Bp // bb,)

    def const_spec(shape):
        return pl.BlockSpec(shape, lambda i: (0, 0))

    out = pl.pallas_call(
        _policy_fused_kernel,
        out_shape=jax.ShapeDtypeStruct((Bp, 128), jnp.float32),
        grid=grid,
        in_specs=[
            pl.BlockSpec((bb, 16), lambda i: (i, 0)),      # x: blocked along batch
            const_spec((16, 144)),                         # W1_big
            const_spec((144, 128)),                        # W2_big
            const_spec((128, 64)),                         # W3
            const_spec((192, 64)),                         # fc1..fc3 stacked
            const_spec((64, 128)),                         # fc4 (lane-dense padded)
            const_spec((8, 144)),                          # packed biases
        ],
        out_specs=pl.BlockSpec((bb, 128), lambda i: (i, 0)),
        compiler_params=pltpu.CompilerParams(
            dimension_semantics=("parallel",),
            vmem_limit_bytes=48 * 1024 * 1024),
    )(x, kparams["w1"], kparams["w2"], kparams["w3"],
      kparams["fcw"], kparams["fw4"], kparams["bias"])
    return out[:B, :out_size]


# Pure-JAX reference (correctness check only; uses PyTorch-layout f32 params)
def reference_forward(params, x_nchw):
    def conv(x, w, b):
        y = jax.lax.conv_general_dilated(
            x, w, window_strides=(1, 1), padding="VALID",
            dimension_numbers=("NCHW", "OIHW", "NCHW"))
        return jax.nn.relu(y + b.reshape(1, -1, 1, 1))

    h = conv(x_nchw, params["conv1_w"], params["conv1_b"])
    h = conv(h, params["conv2_w"], params["conv2_b"])
    h = conv(h, params["conv3_w"], params["conv3_b"])
    h = h.reshape(h.shape[0], -1)
    h = jax.nn.relu(h @ params["fc1_w"].T + params["fc1_b"])
    h = jax.nn.relu(h @ params["fc2_w"].T + params["fc2_b"])
    h = jax.nn.relu(h @ params["fc3_w"].T + params["fc3_b"])
    return jax.nn.softmax(h @ params["fc4_w"].T + params["fc4_b"], axis=-1)


if __name__ == "__main__":
    key = jax.random.PRNGKey(0)
    pkey, xkey, xkey2 = jax.random.split(key, 3)
    params = init_params(pkey)
    kparams = prepare_params(params)   # one-time weight layout / folding, outside jit

    # Synthetic 2048-style board inputs: batch=2, 1 channel, 4x4 grid.
    x = jax.random.uniform(xkey, (2, 1, 4, 4), jnp.float32, 0.0, 11.0)

    fwd = jax.jit(policy_forward)
    out = jax.block_until_ready(fwd(kparams, x))
    ref = reference_forward(params, x)
    assert out.shape == (2, 4), out.shape
    # tolerances account for the EUP approximate reciprocal + bf16 MXU operands
    assert jnp.allclose(jnp.sum(out, axis=-1), 1.0, atol=2e-3)
    assert jnp.allclose(out, ref, atol=2e-2), (out, ref)

    # Batched-grid path (ragged batch, multiple blocks, parallel axis) sanity check.
    xb = jax.random.uniform(xkey2, (1000, 1, 4, 4), jnp.float32, 0.0, 11.0)
    fwd_big = jax.jit(lambda kp, xx: policy_forward(kp, xx, block_b=256))
    out_big = jax.block_until_ready(fwd_big(kparams, xb))
    ref_big = reference_forward(params, xb)
    assert out_big.shape == (1000, 4), out_big.shape
    assert jnp.allclose(jnp.sum(out_big, axis=-1), 1.0, atol=2e-3)
    assert jnp.allclose(out_big, ref_big, atol=2e-2), float(jnp.max(jnp.abs(out_big - ref_big)))

    print("KERNEL_OK")
</pallas_src>

<mosaic_0001>
module attributes {stable_mosaic.version = 11 : i64} {
  func.func @_policy_fused_kernel(%arg0: i32, %arg1: memref<2x16xf32, #tpu.memory_space<vmem>>, %arg2: memref<16x144xbf16, #tpu.memory_space<vmem>>, %arg3: memref<144x128xbf16, #tpu.memory_space<vmem>>, %arg4: memref<128x64xbf16, #tpu.memory_space<vmem>>, %arg5: memref<192x64xbf16, #tpu.memory_space<vmem>>, %arg6: memref<64x128xbf16, #tpu.memory_space<vmem>>, %arg7: memref<8x144xf32, #tpu.memory_space<vmem>>, %arg8: memref<2x128xf32, #tpu.memory_space<vmem>>) attributes {dimension_semantics = [#tpu.dimension_semantics<parallel>], iteration_bounds = array<i64: 1>, scalar_prefetch = 0 : i64, scratch_operands = 0 : i64, tpu.core_type = #tpu.core_type<tc>, window_params = [{transform_indices = @transform_0, window_bounds = array<i64: 2, 16>}, {pipeline_mode = #tpu.pipeline_mode<synchronous>, transform_indices = @transform_1, window_bounds = array<i64: 16, 144>}, {pipeline_mode = #tpu.pipeline_mode<synchronous>, transform_indices = @transform_2, window_bounds = array<i64: 144, 128>}, {pipeline_mode = #tpu.pipeline_mode<synchronous>, transform_indices = @transform_3, window_bounds = array<i64: 128, 64>}, {pipeline_mode = #tpu.pipeline_mode<synchronous>, transform_indices = @transform_4, window_bounds = array<i64: 192, 64>}, {pipeline_mode = #tpu.pipeline_mode<synchronous>, transform_indices = @transform_5, window_bounds = array<i64: 64, 128>}, {pipeline_mode = #tpu.pipeline_mode<synchronous>, transform_indices = @transform_6, window_bounds = array<i64: 8, 144>}, {transform_indices = @transform_7, window_bounds = array<i64: 2, 128>}]} {
    %c0 = arith.constant 0 : index
    %c0_0 = arith.constant 0 : index
    %0 = vector.load %arg1[%c0, %c0_0] : memref<2x16xf32, #tpu.memory_space<vmem>>, vector<2x16xf32>
    %1 = arith.truncf %0 : vector<2x16xf32> to vector<2x16xbf16>
    %c0_1 = arith.constant 0 : index
    %c0_2 = arith.constant 0 : index
    %2 = vector.load %arg7[%c0_1, %c0_2] : memref<8x144xf32, #tpu.memory_space<vmem>>, vector<8x144xf32>
    %3 = vector.extract_strided_slice %2 {offsets = [0, 0], sizes = [1, 144], strides = [1, 1]} : vector<8x144xf32> to vector<1x144xf32>
    %4 = vector.extract_strided_slice %2 {offsets = [1, 0], sizes = [1, 128], strides = [1, 1]} : vector<8x144xf32> to vector<1x128xf32>
    %5 = vector.extract_strided_slice %2 {offsets = [2, 0], sizes = [1, 64], strides = [1, 1]} : vector<8x144xf32> to vector<1x64xf32>
    %6 = vector.extract_strided_slice %2 {offsets = [3, 0], sizes = [1, 64], strides = [1, 1]} : vector<8x144xf32> to vector<1x64xf32>
    %7 = vector.extract_strided_slice %2 {offsets = [4, 0], sizes = [1, 64], strides = [1, 1]} : vector<8x144xf32> to vector<1x64xf32>
    %8 = vector.extract_strided_slice %2 {offsets = [5, 0], sizes = [1, 64], strides = [1, 1]} : vector<8x144xf32> to vector<1x64xf32>
    %9 = vector.extract_strided_slice %2 {offsets = [6, 0], sizes = [1, 128], strides = [1, 1]} : vector<8x144xf32> to vector<1x128xf32>
    %c0_3 = arith.constant 0 : index
    %c0_4 = arith.constant 0 : index
    %10 = vector.load %arg2[%c0_3, %c0_4] : memref<16x144xbf16, #tpu.memory_space<vmem>>, vector<16x144xbf16>
    %cst = arith.constant dense<0.000000e+00> : vector<2x144xf32>
    %11 = tpu.matmul %1, %10, %cst {dimension_numbers = #tpu.dot_dimension_numbers<[1], [0], [0], [1], [0, 0, 1, 1], [], []>} : vector<2x16xbf16>, vector<16x144xbf16>, vector<2x144xf32> -> vector<2x144xf32>
    %12 = vector.broadcast %3 : vector<1x144xf32> to vector<2x144xf32>
    %13 = arith.addf %11, %12 : vector<2x144xf32>
    %cst_5 = arith.constant 0.000000e+00 : f32
    %14 = vector.broadcast %cst_5 : f32 to vector<2x144xf32>
    %15 = arith.maximumf %13, %14 : vector<2x144xf32>
    %16 = arith.truncf %15 : vector<2x144xf32> to vector<2x144xbf16>
    %c0_6 = arith.constant 0 : index
    %c0_7 = arith.constant 0 : index
    %17 = vector.load %arg3[%c0_6, %c0_7] : memref<144x128xbf16, #tpu.memory_space<vmem>>, vector<144x128xbf16>
    %cst_8 = arith.constant dense<0.000000e+00> : vector<2x128xf32>
    %18 = tpu.matmul %16, %17, %cst_8 {dimension_numbers = #tpu.dot_dimension_numbers<[1], [0], [0], [1], [0, 0, 1, 1], [], []>} : vector<2x144xbf16>, vector<144x128xbf16>, vector<2x128xf32> -> vector<2x128xf32>
    %19 = vector.broadcast %4 : vector<1x128xf32> to vector<2x128xf32>
    %20 = arith.addf %18, %19 : vector<2x128xf32>
    %cst_9 = arith.constant 0.000000e+00 : f32
    %21 = vector.broadcast %cst_9 : f32 to vector<2x128xf32>
    %22 = arith.maximumf %20, %21 : vector<2x128xf32>
    %23 = arith.truncf %22 : vector<2x128xf32> to vector<2x128xbf16>
    %c0_10 = arith.constant 0 : index
    %c0_11 = arith.constant 0 : index
    %24 = vector.load %arg4[%c0_10, %c0_11] : memref<128x64xbf16, #tpu.memory_space<vmem>>, vector<128x64xbf16>
    %cst_12 = arith.constant dense<0.000000e+00> : vector<2x64xf32>
    %25 = tpu.matmul %23, %24, %cst_12 {dimension_numbers = #tpu.dot_dimension_numbers<[1], [0], [0], [1], [0, 0, 1, 1], [], []>} : vector<2x128xbf16>, vector<128x64xbf16>, vector<2x64xf32> -> vector<2x64xf32>
    %26 = vector.broadcast %5 : vector<1x64xf32> to vector<2x64xf32>
    %27 = arith.addf %25, %26 : vector<2x64xf32>
    %cst_13 = arith.constant 0.000000e+00 : f32
    %28 = vector.broadcast %cst_13 : f32 to vector<2x64xf32>
    %29 = arith.maximumf %27, %28 : vector<2x64xf32>
    %30 = arith.truncf %29 : vector<2x64xf32> to vector<2x64xbf16>
    %c0_14 = arith.constant 0 : index
    %c0_15 = arith.constant 0 : index
    %31 = vector.load %arg5[%c0_14, %c0_15] : memref<192x64xbf16, #tpu.memory_space<vmem>>, vector<64x64xbf16>
    %cst_16 = arith.constant dense<0.000000e+00> : vector<2x64xf32>
    %32 = tpu.matmul %30, %31, %cst_16 {dimension_numbers = #tpu.dot_dimension_numbers<[1], [0], [0], [1], [0, 0, 1, 1], [], []>} : vector<2x64xbf16>, vector<64x64xbf16>, vector<2x64xf32> -> vector<2x64xf32>
    %33 = vector.broadcast %6 : vector<1x64xf32> to vector<2x64xf32>
    %34 = arith.addf %32, %33 : vector<2x64xf32>
    %cst_17 = arith.constant 0.000000e+00 : f32
    %35 = vector.broadcast %cst_17 : f32 to vector<2x64xf32>
    %36 = arith.maximumf %34, %35 : vector<2x64xf32>
    %37 = arith.truncf %36 : vector<2x64xf32> to vector<2x64xbf16>
    %c64 = arith.constant 64 : index
    %c0_18 = arith.constant 0 : index
    %38 = vector.load %arg5[%c64, %c0_18] : memref<192x64xbf16, #tpu.memory_space<vmem>>, vector<64x64xbf16>
    %cst_19 = arith.constant dense<0.000000e+00> : vector<2x64xf32>
    %39 = tpu.matmul %37, %38, %cst_19 {dimension_numbers = #tpu.dot_dimension_numbers<[1], [0], [0], [1], [0, 0, 1, 1], [], []>} : vector<2x64xbf16>, vector<64x64xbf16>, vector<2x64xf32> -> vector<2x64xf32>
    %40 = vector.broadcast %7 : vector<1x64xf32> to vector<2x64xf32>
    %41 = arith.addf %39, %40 : vector<2x64xf32>
    %cst_20 = arith.constant 0.000000e+00 : f32
    %42 = vector.broadcast %cst_20 : f32 to vector<2x64xf32>
    %43 = arith.maximumf %41, %42 : vector<2x64xf32>
    %44 = arith.truncf %43 : vector<2x64xf32> to vector<2x64xbf16>
    %c128 = arith.constant 128 : index
    %c0_21 = arith.constant 0 : index
    %45 = vector.load %arg5[%c128, %c0_21] : memref<192x64xbf16, #tpu.memory_space<vmem>>, vector<64x64xbf16>
    %cst_22 = arith.constant dense<0.000000e+00> : vector<2x64xf32>
    %46 = tpu.matmul %44, %45, %cst_22 {dimension_numbers = #tpu.dot_dimension_numbers<[1], [0], [0], [1], [0, 0, 1, 1], [], []>} : vector<2x64xbf16>, vector<64x64xbf16>, vector<2x64xf32> -> vector<2x64xf32>
    %47 = vector.broadcast %8 : vector<1x64xf32> to vector<2x64xf32>
    %48 = arith.addf %46, %47 : vector<2x64xf32>
    %cst_23 = arith.constant 0.000000e+00 : f32
    %49 = vector.broadcast %cst_23 : f32 to vector<2x64xf32>
    %50 = arith.maximumf %48, %49 : vector<2x64xf32>
    %51 = arith.truncf %50 : vector<2x64xf32> to vector<2x64xbf16>
    %c0_24 = arith.constant 0 : index
    %c0_25 = arith.constant 0 : index
    %52 = vector.load %arg6[%c0_24, %c0_25] : memref<64x128xbf16, #tpu.memory_space<vmem>>, vector<64x128xbf16>
    %cst_26 = arith.constant dense<0.000000e+00> : vector<2x128xf32>
    %53 = tpu.matmul %51, %52, %cst_26 {dimension_numbers = #tpu.dot_dimension_numbers<[1], [0], [0], [1], [0, 0, 1, 1], [], []>} : vector<2x64xbf16>, vector<64x128xbf16>, vector<2x128xf32> -> vector<2x128xf32>
    %54 = vector.broadcast %9 : vector<1x128xf32> to vector<2x128xf32>
    %55 = arith.addf %53, %54 : vector<2x128xf32>
    %cst_27 = arith.constant dense<0xFF800000> : vector<2xf32>
    %56 = vector.multi_reduction <maximumf>, %55, %cst_27 [1] : vector<2x128xf32> to vector<2xf32>
    %57 = vector.shape_cast %56 : vector<2xf32> to vector<2x1xf32>
    %58 = vector.broadcast %57 : vector<2x1xf32> to vector<2x128xf32>
    %59 = arith.subf %55, %58 : vector<2x128xf32>
    %60 = math.exp %59 : vector<2x128xf32>
    %cst_28 = arith.constant dense<0.000000e+00> : vector<2xf32>
    %61 = vector.multi_reduction <add>, %60, %cst_28 [1] : vector<2x128xf32> to vector<2xf32>
    %62 = vector.shape_cast %61 : vector<2xf32> to vector<2x1xf32>
    %63 = tpu.reciprocal %62 {approx = true} : vector<2x1xf32> -> vector<2x1xf32>
    %64 = vector.broadcast %63 : vector<2x1xf32> to vector<2x128xf32>
    %65 = arith.mulf %60, %64 : vector<2x128xf32>
    %c0_29 = arith.constant 0 : index
    %c0_30 = arith.constant 0 : index
    %66 = vector.load %arg8[%c0_29, %c0_30] : memref<2x128xf32, #tpu.memory_space<vmem>>, vector<2x128xf32>
    tpu.vector_store %arg8[%c0_29, %c0_30], %65 {strides = array<i32>} : memref<2x128xf32, #tpu.memory_space<vmem>>, vector<2x128xf32>,
    return
  }
  func.func @transform_0(%arg0: i32) -> (i32, i32) {
    %c0_i32 = arith.constant 0 : i32
    %c0_i32_0 = arith.constant 0 : i32
    return %arg0, %c0_i32 : i32, i32
  }
  func.func @transform_1(%arg0: i32) -> (i32, i32) {
    %c0_i32 = arith.constant 0 : i32
    %c0_i32_0 = arith.constant 0 : i32
    %c0_i32_1 = arith.constant 0 : i32
    return %c0_i32, %c0_i32_0 : i32, i32
  }
  func.func @transform_2(%arg0: i32) -> (i32, i32) {
    %c0_i32 = arith.constant 0 : i32
    %c0_i32_0 = arith.constant 0 : i32
    %c0_i32_1 = arith.constant 0 : i32
    return %c0_i32, %c0_i32_0 : i32, i32
  }
  func.func @transform_3(%arg0: i32) -> (i32, i32) {
    %c0_i32 = arith.constant 0 : i32
    %c0_i32_0 = arith.constant 0 : i32
    %c0_i32_1 = arith.constant 0 : i32
    return %c0_i32, %c0_i32_0 : i32, i32
  }
  func.func @transform_4(%arg0: i32) -> (i32, i32) {
    %c0_i32 = arith.constant 0 : i32
    %c0_i32_0 = arith.constant 0 : i32
    %c0_i32_1 = arith.constant 0 : i32
    return %c0_i32, %c0_i32_0 : i32, i32
  }
  func.func @transform_5(%arg0: i32) -> (i32, i32) {
    %c0_i32 = arith.constant 0 : i32
    %c0_i32_0 = arith.constant 0 : i32
    %c0_i32_1 = arith.constant 0 : i32
    return %c0_i32, %c0_i32_0 : i32, i32
  }
  func.func @transform_6(%arg0: i32) -> (i32, i32) {
    %c0_i32 = arith.constant 0 : i32
    %c0_i32_0 = arith.constant 0 : i32
    %c0_i32_1 = arith.constant 0 : i32
    return %c0_i32, %c0_i32_0 : i32, i32
  }
  func.func @transform_7(%arg0: i32) -> (i32, i32) {
    %c0_i32 = arith.constant 0 : i32
    %c0_i32_0 = arith.constant 0 : i32
    return %arg0, %c0_i32 : i32, i32
  }
}

</mosaic_0001>

<bundles_post_ra>
// kernel: policy_forward.1
= control target key start
LH: loop header
LB: loop body
LE: loop exit
PB: predicated region body
PF: predicated region fallthrough
CT: control target
= control target key end

     0   :  { %vm46_vm0 = vcmask 130048   ;;  %s889_s0 = inlined_call_operand.vmem [shape: f32[2,16], index: 0, kind: input, shape index: {}]   ;;  %s890_s1 = inlined_call_operand.vmem [shape: bf16[16,144], index: 1, kind: input, shape index: {}]   ;;  %s891_s2 = inlined_call_operand.vmem [shape: bf16[144,128], index: 2, kind: input, shape index: {}]   ;;  %s892_s3 = inlined_call_operand.vmem [shape: bf16[128,64], index: 3, kind: input, shape index: {}]   ;;  %s893_s4 = inlined_call_operand.vmem [shape: bf16[192,64], index: 4, kind: input, shape index: {}]   ;;  %s894_s5 = inlined_call_operand.vmem [shape: bf16[64,128], index: 5, kind: input, shape index: {}]   ;;  %s895_s6 = inlined_call_operand.vmem [shape: f32[8,144], index: 6, kind: input, shape index: {}]   ;;  %s896_s7 = inlined_call_operand.hbm [shape: f32[2,128], index: 7, kind: output, shape index: {}]  }
   0x1   :  { %v498_v0 = vld [vmem:[%s890_s1] sm:$0xf]  ;;  %v644_v1 = vld [vmem:[%s890_s1 + $0x4] sm:$0xf0]  ;;  %v643_v2 = vld [vmem:[%s890_s1 + $0x4] sm:$0xf] }
   0x2   :  { %v499_v3 = vor.u32 %v644_v1, %v498_v0  ;;  %v500_v4 = vld [vmem:[%s890_s1 + $0x8] sm:$0xf0]  ;;  %v28_v5 = vld [vmem:[%s889_s0] sm:$0x3]  ;;  %v652_v6 = vld [vmem:[%s891_s2 + $0x38] sm:$0xff] }
   0x3   :  { %v503_v7 = vor.u32 %v643_v2, %v500_v4  ;;  %v29_v8 = vpack.c.bf16 %v28_v5, %v28_v5  ;;  %156 = vmatpush.bf16.msra.mxu2 %v652_v6  ;;  %v651_v9 = vld [vmem:[%s891_s2 + $0x30] sm:$0xff] }
   0x4   :  { %57 = vmatpush.bf16.msra.mxu0 %v499_v3 }
   0x5   :  { %70 = vmatpush.bf16.msra.mxu1 %v503_v7 }
   0x6   :  { %12 = vsyncpa [#allocation3], 0  ;;  %v650_v10 = vld [vmem:[%s891_s2 + $0x28] sm:$0xff]  ;;  %v649_v11 = vld [vmem:[%s891_s2 + $0x20] sm:$0xff]  ;;  %vm297_vm1 = vcmask 523264   ;;  %vm467_vm2 = vcmask 1041408  }
   0x7   :  { %504 = vmatmul.msk.bf16.vlgmr.msra.gmra.mxu0 %vm46_vm0, %v29_v8  ;;  %157 = vmatpush.bf16.msra.mxu2 %v651_v9  ;;  %v648_v12 = vld [vmem:[%s891_s2 + $0x18] sm:$0xff]  ;;  %v647_v13 = vld [vmem:[%s891_s2 + $0x10] sm:$0xff]  ;;  %v646_v14 = vld [vmem:[%s891_s2 + $0x8] sm:$0xff] }
   0x8   :  { %505 = vmatmul.msk.bf16.vlgmr.msra.gmra.mxu1 %vm46_vm0, %v29_v8  ;;  %v645_v15 = vld [vmem:[%s891_s2] sm:$0xff]  ;;  %v661_v17 = vld [vmem:[%s892_s3 + $0x38] sm:$0xff]  ;;  %v660_v18 = vld [vmem:[%s892_s3 + $0x30] sm:$0xff] }
   0x9   :  { %v653_v16 = vld [vmem:[%s891_s2 + $0x40] sm:$0xff]  ;;  %249 = vmatpush.bf16.msrb.mxu0 %v661_v17  ;;  %v659_v19 = vld [vmem:[%s892_s3 + $0x28] sm:$0xff]  ;;  %v657_v21 = vld [vmem:[%s892_s3 + $0x18] sm:$0xff] }
   0xa   :  { %176 = vmatpush.bf16.msra.mxu3 %v653_v16  ;;  %v658_v20 = vld [vmem:[%s892_s3 + $0x20] sm:$0xff]  ;;  %v31_v23 = vld [vmem:[%s895_s6 + $0x8] sm:$0xff]  ;;  %v656_v24 = vld [vmem:[%s892_s3 + $0x10] sm:$0xff] }
   0xb   :  { %158 = vmatpush.bf16.msra.mxu2 %v650_v10  ;;  %v812_v22 = vld [vmem:[%s895_s6] sm:$0xff]  ;;  %v35_v26 = vperm.slane %v31_v23, 0  ;;  %v655_v37 = vld [vmem:[%s892_s3 + $0x8] sm:$0xff]  ;;  %v665_v39 = vld [vmem:[%s893_s4 + $0x18] sm:$0xff] }
   0xc   :  { %v34_v25 = vperm.slane %v812_v22, 0  ;;  %v654_v38 = vld [vmem:[%s892_s3] sm:$0xff]  ;;  %305 = vmatpush.bf16.msrb.mxu1 %v665_v39  ;;  %v664_v40 = vld [vmem:[%s893_s4 + $0x10] sm:$0xff]  ;;  %v663_v41 = vld [vmem:[%s893_s4 + $0x8] sm:$0xff]  ;;  %v98_v42 = vperm.slane %v812_v22, 1  ;;  %v200_v55 = vperm.slane %v812_v22, 2 }
   0xd   :  { %250 = vmatpush.bf16.msrb.mxu0 %v660_v18  ;;  %v662_v51 = vld [vmem:[%s893_s4] sm:$0xff]  ;;  %v669_v52 = vld [vmem:[%s893_s4 + $0x38] sm:$0xff]  ;;  %v668_v53 = vld [vmem:[%s893_s4 + $0x30] sm:$0xff]  ;;  %v272_v1 = vperm.slane %v812_v22, 3  ;;  %v375_v18 = vperm.slane %v812_v22, 5  ;;  %s487_s3 = sshll.u32 %s896_s7, 4  ;;  %s488_s3 = int_to_ptr.hbm [resolvable:$true] %s487_s3 }
   0xe   :  { %356 = vmatpush.bf16.msrb.mxu3 %v669_v52  ;;  %v667_v54 = vld [vmem:[%s893_s4 + $0x28] sm:$0xff]  ;;  %v666_v61 = vld [vmem:[%s893_s4 + $0x20] sm:$0xff]  ;;  %v673_v62 = vld [vmem:[%s893_s4 + $0x58] sm:$0xff] }
   0xf   :  { %159 = vmatpush.bf16.msra.mxu2 %v649_v11  ;;  %v672_v63 = vld [vmem:[%s893_s4 + $0x50] sm:$0xff]  ;;  %v671_v0 = vld [vmem:[%s893_s4 + $0x48] sm:$0xff]  ;;  %v670_v7 = vld [vmem:[%s893_s4 + $0x40] sm:$0xff]  ;;  %v324_v11 = vperm.slane %v812_v22, 4 }
  0x10   :  { %306 = vmatpush.bf16.msrb.mxu1 %v664_v40  ;;  %v677_v8 = vld [vmem:[%s894_s5 + $0x18] sm:$0xff]  ;;  %v676_v9 = vld [vmem:[%s894_s5 + $0x10] sm:$0xff]  ;;  %v675_v10 = vld [vmem:[%s894_s5 + $0x8] sm:$0xff] }
  0x11   :  { %251 = vmatpush.bf16.msrb.mxu0 %v659_v19  ;;  %v674_v17 = vld [vmem:[%s894_s5] sm:$0xff]  ;;  %s709_s5 = smov [#allocation2]  }
  0x12   :  { %357 = vmatpush.bf16.msrb.mxu3 %v668_v53  ;;  %s485_s23 = sshll.u32 %s709_s5, 4  ;;  %s486_s23 = int_to_ptr.vmem [resolvable:$true] %s485_s23 }
  0x13   :  { %160 = vmatpush.bf16.msra.mxu2 %v648_v12 }
  0x14   :  { %307 = vmatpush.bf16.msrb.mxu1 %v663_v41 }
  0x15   :  { %252 = vmatpush.bf16.msrb.mxu0 %v658_v20 }
  0x16   :  { %358 = vmatpush.bf16.msrb.mxu3 %v667_v54 }
  0x17   :  { %161 = vmatpush.bf16.msra.mxu2 %v647_v13 }
  0x18   :  { %308 = vmatpush.bf16.msrb.mxu1 %v662_v51 }
  0x19   :  { %253 = vmatpush.bf16.msrb.mxu0 %v657_v21 }
  0x1a   :  { %359 = vmatpush.bf16.msrb.mxu3 %v666_v61 }
  0x1b   :  { %162 = vmatpush.bf16.msra.mxu2 %v646_v14 }
  0x1c   :  { %407 = vmatpush.bf16.msra.mxu1 %v673_v62 }
  0x1d   :  { %254 = vmatpush.bf16.msrb.mxu0 %v656_v24 }
  0x1f   :  { %163 = vmatpush.bf16.msra.mxu2 %v645_v15 }
  0x20   :  { %408 = vmatpush.bf16.msra.mxu1 %v672_v63 }
  0x21   :  { %255 = vmatpush.bf16.msrb.mxu0 %v655_v37 }
  0x24   :  { %409 = vmatpush.bf16.msra.mxu1 %v671_v0 }
  0x25   :  { %256 = vmatpush.bf16.msrb.mxu0 %v654_v38 }
  0x28   :  { %410 = vmatpush.bf16.msra.mxu1 %v670_v7 }
  0x84   :  { %v59_v27 = vpop.f32.mrf.mxu0 }
  0x85   :  { %v60_v28 = vadd.f32 %v59_v27, %v34_v25  ;;  %v72_v29 = vpop.f32.mrf.mxu1  ;;  %v426_v25 = vperm.slane %v812_v22, 6 }
  0x86   :  { %v73_v30 = vadd.f32 %v72_v29, %v35_v26 }
  0x87   :  { %v76_v31 = vmax.f32 %v60_v28, 0.0 }
  0x88   :  { %v77_v32 = vmax.f32 %v73_v30, 0.0 }
  0x89   :  { %v78_v33 = vpack.c.bf16 %v76_v31, %v76_v31 }
  0x8a   :  { %v79_v34 = vpack.c.bf16 %v77_v32, %v77_v32 }
  0x8b   :  { %164 = vmatmul.bf16.vlgmr.msra.gmra.mxu2 %v78_v33 }
  0x8c   :  { %542 = vmatmul.msk.bf16.vlgmr.msra.gmra.mxu3 %vm46_vm0, %v79_v34  ;;  %v61_v35 = vpop.f32.mrf.mxu0 }
  0x8d   :  { %v74_v36 = vpop.f32.mrf.mxu1  ;;  %458 = vmatpush.bf16.msra.mxu3 %v677_v8 }
  0x91   :  { %459 = vmatpush.bf16.msra.mxu3 %v676_v9 }
  0x95   :  { %460 = vmatpush.bf16.msra.mxu3 %v675_v10 }
  0x99   :  { %461 = vmatpush.bf16.msra.mxu3 %v674_v17 }
 0x10e   :  { %v165_v43 = vpop.f32.mrf.mxu2 }
 0x10f   :  { %v166_v44 = vadd.f32 %v165_v43, %v98_v42  ;;  %v178_v45 = vpop.f32.mrf.mxu3 }
 0x111   :  { %v179_v46 = vadd.f32 %v178_v45, %v166_v44 }
 0x113   :  { %v182_v47 = vmax.f32 %v179_v46, 0.0 }
 0x115   :  { %v183_v48 = vpack.c.bf16 %v182_v47, %v182_v47 }
 0x116   :  { %v167_v49 = vpop.f32.mrf.mxu2 }
 0x117   :  { %v180_v50 = vpop.f32.mrf.mxu3  ;;  %257 = vmatmul.bf16.vlgmr.msrb.gmra.mxu0 %v183_v48 }
 0x194   :  { %v258_v56 = vpop.f32.mrf.mxu0 }
 0x195   :  { %v259_v57 = vadd.f32 %v258_v56, %v200_v55 }
 0x197   :  { %v262_v58 = vmax.f32 %v259_v57, 0.0 }
 0x199   :  { %v263_v59 = vpack.c.bf16 %v262_v58, %v262_v58 }
 0x19b   :  { %591 = vmatmul.msk.bf16.vlgmr.msrb.gmra.mxu1 %vm297_vm1, %v263_v59 }
 0x19c   :  { %v260_v60 = vpop.f32.mrf.mxu0 }
 0x218   :  { %v310_v2 = vpop.f32.mrf.mxu1 }
 0x219   :  { %v311_v3 = vadd.f32 %v310_v2, %v272_v1 }
 0x21b   :  { %v314_v4 = vmax.f32 %v311_v3, 0.0 }
 0x21d   :  { %v315_v5 = vpack.c.bf16 %v314_v4, %v314_v4 }
 0x21f   :  { %608 = vmatmul.msk.bf16.vlgmr.msrb.gmra.mxu3 %vm297_vm1, %v315_v5 }
 0x220   :  { %v312_v6 = vpop.f32.mrf.mxu1 }
 0x2a2   :  { %v361_v12 = vpop.f32.mrf.mxu3 }
 0x2a3   :  { %v362_v13 = vadd.f32 %v361_v12, %v324_v11 }
 0x2a5   :  { %v365_v14 = vmax.f32 %v362_v13, 0.0 }
 0x2a7   :  { %v366_v15 = vpack.c.bf16 %v365_v14, %v365_v14 }
 0x2a9   :  { %625 = vmatmul.msk.bf16.vlgmr.msra.gmra.mxu1 %vm297_vm1, %v366_v15 }
 0x2aa   :  { %v363_v16 = vpop.f32.mrf.mxu3 }
 0x326   :  { %v412_v19 = vpop.f32.mrf.mxu1 }
 0x327   :  { %v413_v20 = vadd.f32 %v412_v19, %v375_v18 }
 0x329   :  { %v416_v21 = vmax.f32 %v413_v20, 0.0 }
 0x32b   :  { %v417_v23 = vpack.c.bf16 %v416_v21, %v416_v21 }
 0x32d   :  { %642 = vmatmul.msk.bf16.vlgmr.msra.gmra.mxu3 %vm297_vm1, %v417_v23 }
 0x32e   :  { %v414_v24 = vpop.f32.mrf.mxu1 }
 0x3b0   :  { %v463_v26 = vpop.f32.mrf.mxu3 }
 0x3b1   :  { %v464_v27 = vadd.f32 %v463_v26, %v426_v25 }
 0x3b3   :  { %v468_v28 = vsel %vm467_vm2, %v464_v27, -inf }
 0x3b4   :  { %469 = vmax.xlane.f32.xlu0 %v468_v28 }
 0x3b8   :  { %v465_v29 = vpop.f32.mrf.mxu3 }
 0x427   :  { %v470_v30 = vpop.xlane.xlu0 %469 }
 0x428   :  { %v471_v31 = vsub.f32 %v464_v27, %v470_v30 }
 0x42a   :  { %v472_v32 = vmul.f32 1.442695, %v471_v31 }
 0x42c   :  { %679 = vpow2.f32 %v472_v32 }
 0x432   :  { %v680_v33 = vpop.eup %679 }
 0x433   :  { %v474_v34 = vsel %vm467_vm2, %v680_v33, 0.0 }
 0x434   :  { %475 = vadd.xlane.f32.xlu0 %v474_v34 }
 0x4a7   :  { %v476_v35 = vpop.xlane.xlu0 %475 }
 0x4a8   :  { %681 = vrcp.f32 %v476_v35 }
 0x4ae   :  { %v682_v22 = vpop.eup %681 }
 0x4af   :  { %v478_v36 = vmul.f32 %v682_v22, %v680_v33 }
 0x4b1   :  { %479 = vst [vmem:[#allocation2] sm:$0x3] %v478_v36 }
 0x4b2   :  { %490 = dma.vmem_to_hbm [thread:$0]  %s486_s23, 32, %s488_s3, [#allocation3]  }
 0x4b3   :  { %707 = dma.done.wait [#allocation3], 32  }
 0x4b4   :  { %708 = vsyncadd [#allocation3], 4294967264 }
 0x4b5   :  { %495 = vsyncpa [#allocation3], 1 }

</bundles_post_ra>
